<compile_context>
chip_gen: v7x
topology: tpu7x:2x2x1
jax: 0.10.0
libtpu: 0.0.40
codegen_flags: <defaults>
</compile_context>

<pallas_src>
import functools
import math

import jax
import jax.numpy as jnp
from jax.experimental import pallas as pl
from jax.experimental.pallas import tpu as pltpu

_TILE_BYTES = 4 * 1024 * 1024        # per-tile budget for the copy path
_VMEM_LIMIT = 32 * 1024 * 1024       # safe scoped-VMEM limit on v5e/v6e/v7x


# ---------------------------------------------------------------------------
# Zero-traffic identity: output aliases the input buffer in HBM; the kernel
# body only pins the dependency -- no bytes are moved.
# ---------------------------------------------------------------------------
def _touch_kernel(x_ref, o_ref):
    del x_ref
    # Fake read+write dep: marks the aliased output as produced by this
    # kernel without any data movement.
    pltpu.touch(o_ref)


@functools.cache
def _alias_identity_fn(shape, dtype_name):
    dtype = jnp.dtype(dtype_name)
    call = pl.pallas_call(
        _touch_kernel,
        out_shape=jax.ShapeDtypeStruct(shape, dtype),
        in_specs=[pl.BlockSpec(memory_space=pl.ANY)],
        out_specs=pl.BlockSpec(memory_space=pl.ANY),
        input_output_aliases={0: 0},
        compiler_params=pltpu.CompilerParams(has_side_effects=True),
        cost_estimate=pl.CostEstimate(flops=0, transcendentals=0,
                                      bytes_accessed=0),
    )
    # Donating the operand realizes the HBM aliasing at the top level
    # (no defensive copy is inserted by XLA).
    return jax.jit(call, donate_argnums=(0,))


# ---------------------------------------------------------------------------
# Real identity copy (benchmark path): tiled along the leading dim only, so
# the last two block dims equal the full array dims (no layout constraints).
# ---------------------------------------------------------------------------
def _copy_kernel(x_ref, o_ref):
    o_ref[...] = x_ref[...]


@functools.cache
def _copy_identity_fn(shape, dtype_name):
    dtype = jnp.dtype(dtype_name)
    ndim = len(shape)
    total_bytes = math.prod(shape) * dtype.itemsize if shape else dtype.itemsize

    if ndim < 2:
        # Small / rank-deficient inputs: single full-extent block.
        # TODO(synk): very large 1-D arrays would need a tiled path here.
        return jax.jit(pl.pallas_call(
            _copy_kernel,
            out_shape=jax.ShapeDtypeStruct(shape, dtype),
            cost_estimate=pl.CostEstimate(flops=0, transcendentals=0,
                                          bytes_accessed=2 * total_bytes),
        ))

    # Tile the leading dim; last two block dims == full array dims, which
    # satisfies the (8,128) / packed-sublane rule for any dtype without a
    # relayout or masked stores.
    row_bytes = math.prod(shape[1:]) * dtype.itemsize
    chunk = max(1, min(shape[0], _TILE_BYTES // max(row_bytes, 1)))
    if chunk >= shape[0] and shape[0] >= 2:
        # Force >= 2 grid steps so the "parallel" axis can shard across
        # v7x's two TensorCores (neutral on v5e/v6e).
        chunk = pl.cdiv(shape[0], 2)
    grid = (pl.cdiv(shape[0], chunk),)
    block = (chunk,) + tuple(shape[1:])
    spec = pl.BlockSpec(block, lambda i: (i,) + (0,) * (ndim - 1))

    call = pl.pallas_call(
        _copy_kernel,
        out_shape=jax.ShapeDtypeStruct(shape, dtype),
        grid=grid,
        in_specs=[spec],
        out_specs=spec,
        compiler_params=pltpu.CompilerParams(
            dimension_semantics=("parallel",),
            vmem_limit_bytes=_VMEM_LIMIT,
        ),
        cost_estimate=pl.CostEstimate(flops=0, transcendentals=0,
                                      bytes_accessed=2 * total_bytes),
    )
    return jax.jit(call)


# ---------------------------------------------------------------------------
# Public wrapper: JAX/Pallas equivalent of PrintLayer.forward.
# ---------------------------------------------------------------------------
def print_layer(x: jax.Array, layer_id, *, via_kernel: bool = False,
                mode: str = "alias") -> jax.Array:
    """Prints (id, type, shape) like the PyTorch module and returns x.

    Default is the zero-cost pass-through.  `via_kernel=True` routes through
    a Pallas kernel: `mode="alias"` is the zero-data-movement aliased kernel
    (the input buffer is donated and returned), `mode="copy"` is a tiled
    HBM->VMEM->HBM identity copy for benchmarking.
    """
    # Side effect of the original module.  Fires per Python call; under an
    # outer jit it fires once per trace rather than once per execution.
    # TODO(synk): use jax.debug.print if strict per-execution prints are needed.
    print(layer_id, type(x), x.shape)

    if not via_kernel:
        # Highest-value path: identity needs no kernel / no HBM traffic.
        return x

    if mode == "alias":
        try:
            return _alias_identity_fn(tuple(x.shape), jnp.dtype(x.dtype).name)(x)
        except Exception:
            # Fallback if the touch/alias lowering is unsupported on this
            # jax/libtpu build: fall through to the tiled copy kernel.
            pass
    return _copy_identity_fn(tuple(x.shape), jnp.dtype(x.dtype).name)(x)


if __name__ == "__main__":
    key = jax.random.PRNGKey(0)
    shape = (2, 4, 16, 16)                       # NCHW conv-net activation
    x = jax.random.normal(key, shape, dtype=jnp.float32)
    # Independent reference array with identical values (x itself gets
    # donated to the alias-kernel path below).
    x_ref = jax.random.normal(key, shape, dtype=jnp.float32)

    # 1) Optimal hot path: pure pass-through, no kernel launched.
    y_fast = print_layer(x, layer_id=0)
    assert y_fast is x

    # 2) Tiled copy kernel (benchmark path): N-D blocks, no reshapes.
    y_copy = jax.block_until_ready(
        print_layer(x, layer_id=1, via_kernel=True, mode="copy"))
    assert y_copy.shape == x_ref.shape and y_copy.dtype == x_ref.dtype
    assert bool(jnp.all(y_copy == x_ref))

    # 3) Aliased touch-only kernel (primary via_kernel path): zero data
    #    movement; x is donated and the result reuses its HBM buffer.
    y = jax.block_until_ready(
        print_layer(x, layer_id=2, via_kernel=True, mode="alias"))
    assert y.shape == x_ref.shape and y.dtype == x_ref.dtype
    assert bool(jnp.all(y == x_ref))

    print("KERNEL_OK")
</pallas_src>

<mosaic_0001>
module attributes {stable_mosaic.version = 11 : i64} {
  func.func @_copy_kernel(%arg0: i32, %arg1: memref<1x4x16x16xf32, #tpu.memory_space<vmem>>, %arg2: memref<1x4x16x16xf32, #tpu.memory_space<vmem>>) attributes {dimension_semantics = [#tpu.dimension_semantics<parallel>], iteration_bounds = array<i64: 2>, scalar_prefetch = 0 : i64, scratch_operands = 0 : i64, tpu.core_type = #tpu.core_type<tc>, window_params = [{transform_indices = @transform_0, window_bounds = array<i64: 1, 4, 16, 16>}, {transform_indices = @transform_1, window_bounds = array<i64: 1, 4, 16, 16>}]} {
    %c0 = arith.constant 0 : index
    %c0_0 = arith.constant 0 : index
    %c0_1 = arith.constant 0 : index
    %c0_2 = arith.constant 0 : index
    %0 = vector.load %arg1[%c0, %c0_0, %c0_1, %c0_2] : memref<1x4x16x16xf32, #tpu.memory_space<vmem>>, vector<1x4x16x16xf32>
    %c0_3 = arith.constant 0 : index
    %c0_4 = arith.constant 0 : index
    %c0_5 = arith.constant 0 : index
    %c0_6 = arith.constant 0 : index
    %1 = vector.load %arg2[%c0_3, %c0_4, %c0_5, %c0_6] : memref<1x4x16x16xf32, #tpu.memory_space<vmem>>, vector<1x4x16x16xf32>
    tpu.vector_store %arg2[%c0_3, %c0_4, %c0_5, %c0_6], %0 {strides = array<i32>} : memref<1x4x16x16xf32, #tpu.memory_space<vmem>>, vector<1x4x16x16xf32>,
    return
  }
  func.func @transform_0(%arg0: i32) -> (i32, i32, i32, i32) {
    %c0_i32 = arith.constant 0 : i32
    %c0_i32_0 = arith.constant 0 : i32
    %c0_i32_1 = arith.constant 0 : i32
    %c0_i32_2 = arith.constant 0 : i32
    return %arg0, %c0_i32, %c0_i32_0, %c0_i32_1 : i32, i32, i32, i32
  }
  func.func @transform_1(%arg0: i32) -> (i32, i32, i32, i32) {
    %c0_i32 = arith.constant 0 : i32
    %c0_i32_0 = arith.constant 0 : i32
    %c0_i32_1 = arith.constant 0 : i32
    %c0_i32_2 = arith.constant 0 : i32
    return %arg0, %c0_i32, %c0_i32_0, %c0_i32_1 : i32, i32, i32, i32
  }
}

</mosaic_0001>

<bundles_post_ra>
// kernel: tpu_custom_call.1
= control target key start
LH: loop header
LB: loop body
LE: loop exit
PB: predicated region body
PF: predicated region fallthrough
CT: control target
= control target key end

     0   :  { %6 = vsyncpa [#allocation3], 0  ;;  %s589_s0 = inlined_call_operand.hbm [shape: f32[2,4,16,16], index: 0, kind: input, shape index: {}]   ;;  %s590_s1 = inlined_call_operand.hbm [shape: f32[2,4,16,16], index: 1, kind: output, shape index: {}]  }
   0x1   :  { %8 = vsyncpa [#allocation3 + $0x1], 0 }
   0x2   :  { %9 = vsyncpa [#allocation4], 0 }
   0x3   :  { %11 = vsyncpa [#allocation4 + $0x1], 0  ;;  %s419_s6 = smov 0   ;;  %s421_s7 = smov 0  }
   0x4   :  { %s423_s8 = smov 0   ;;  %s425_s9 = smov 0  }
   0x5 LB: > { %s440_s10 = sadd.s32 4294967295, %s401_s9   ;;  %s239_s11 = sadd.s32 4294967294, %s401_s9   ;;  %s401_s9 = sphi %s425_s9, %s603_s9   ;;  %s397_s8 = sphi %s423_s8, %s602_s8   ;;  %s393_s7 = sphi %s421_s7, %s601_s7   ;;  %s389_s6 = sphi %s419_s6, %s600_s6  }
   0x6   : > { %s444_s12 = sadd.s32 1, %s401_s9   ;;  %s24_s13 = sadd.s32 1, %s397_s8 }
   0x7   : > { %s21_s14 = ssub.s32 %s401_s9, %s444_s12  ;;  %p31_p0 = scmp.ne.s32.totalorder %s397_s8, %s393_s7 }
   0x8   : > { %p22_p1 = scmp.eq.s32.totalorder %s21_s14, 0  ;;  %p32_p2 = scmp.eq.s32.totalorder %s401_s9, 0 }
   0x9   : > { %p37_p3 = scmp.ne.s32.totalorder %s393_s7, %s389_s6  ;;  %p38_p4 = scmp.eq.s32.totalorder %s440_s10, 0 }
   0xa   : > { %s456_s15 = scalar_select %p22_p1, %s397_s8, %s24_s13  }
   0xb   : > { %p458_p5 = por %p32_p2, %p31_p0  ;;  %p462_p6 = por %p38_p4, %p37_p3 }
   0xc   : > { %p61_p7 = scmp.eq.s32.totalorder %s440_s10, 1  ;;  %p67_p8 = scmp.eq.s32.totalorder %s239_s11, 1 }
   0xd   : > { %p267_p10 = scmp.lt.s32.totalorder %s401_s9, 2  ;;  %s87_s20 = sand.u32 1, %s397_s8  }
   0xe   : > { %p469_p11 = por %p61_p7, %p31_p0  ;;  %p473_p12 = por %p67_p8, %p37_p3 }
   0xf   : > { %s253_s21 = sshll.u32 %s401_s9, 10  ;;  %s242_s22 = sshll.u32 %s87_s20, 6 }
  0x10   : > { %s594_s18 = scalar_select %p469_p11, 1, 0 }
  0x11   : > { %s595_s19 = scalar_select %p473_p12, 1, 0 }
  0x12   : > { %s482_s25 = scalar_lea.hbm %s589_s0, %s253_s21  ;;  %s91_s26 = scalar_lea.vmem [#allocation2], %s242_s22 }
  0x13   : > { %s98_s27 = sshll.u32 %s91_s26, 4  ;;  %p486_p13 = pnand %p267_p10, %p458_p5  ;;  %s490_s27 = int_to_ptr.vmem [resolvable:$true] %s98_s27 }
  0x14   : > { %s492_s29 = scalar_lea.sflag [#allocation3], %s87_s20  ;;  %s305_s30 = scalar_lea.hbm %s482_s25, 1024 }
  0x15   : > { %p306_p0 = scmp.ne.s32.totalorder %s482_s25, %s305_s30  ;;  %p307_p1 = pneg %p486_p13 }
  0x16   : > { %s310_s4 = scalar_lea.hbm %s589_s0, 2048  ;;  %p311_p4 = scmp.lt.u32.totalorder %s482_s25, %s589_s0 }
  0x17   : > { %p308_p2 = pnand %p307_p1, %p306_p0  ;;  %p312_p5 = scmp.lt.u32.totalorder %s310_s4, %s305_s30 }
  0x18   : > { %p314_p8 = scmp.lt.u32.totalorder %s305_s30, %s482_s25 }
  0x19   : > { %p309_p3 = pneg %p308_p2  ;;  %p313_p7 = por %p312_p5, %p311_p4 }
  0x1b   : > { %p315_p10 = por %p314_p8, %p313_p7 }
  0x1d   : > { %p316_p9 = pnand %p315_p10, %p309_p3 }
  0x1f   : > { %319 = shalt.err (!%p316_p9)
}
  0x20   : > { %s320_s13 = scalar_lea.vmem %s490_s27, 1024  ;;  %s403_s14 = smov [#allocation2]  }
  0x21   : > { %p321_p0 = scmp.ne.s32.totalorder %s490_s27, %s320_s13  ;;  %s325_s16 = sshll.u32 %s403_s14, 4  ;;  %s326_s16 = int_to_ptr.vmem [resolvable:$false] %s325_s16 }
  0x22   : > { %s327_s20 = scalar_lea.vmem %s326_s16, 2048  ;;  %p328_p11 = scmp.lt.s32.totalorder %s490_s27, %s326_s16 }
  0x23   : > { %p323_p2 = pnand %p321_p0, %p307_p1  ;;  %p329_p4 = scmp.lt.s32.totalorder %s327_s20, %s320_s13 }
  0x25   : > { %p324_p12 = pneg %p323_p2  ;;  %p330_p5 = por %p329_p4, %p328_p11 }
  0x27   : > { %p331_p7 = pnand %p330_p5, %p324_p12 }
  0x29   : > { %334 = shalt.err (!%p331_p7)
}
  0x2a   : > { %s404_s21 = smov 128   ;;  %s405_s22 = smov 8  }
  0x2b   : > { %262 = dma.hbm_to_vmem [thread:$0]  (!%p486_p13), %s482_s25, 1024, %s490_s27, %s492_s29, %s404_s21, %s404_s21, %s405_s22  }
  0x2c   : > { %p245_p9 = scmp.ge.s32.totalorder %s401_s9, 1  ;;  %p106_p1 = scmp.lt.s32.totalorder %s401_s9, 3 }
  0x2e   : > { %p107_p3 = pnand %p245_p9, %p106_p1 }
  0x2f   : > { %s523_s23 = sand.u32 (!%p107_p3), 1, %s393_s7  }
  0x30   : > { %110 = sbr.rel (%p107_p3) target bundleno = 83 (0x53), region = 24  ;;  %s246_s24 = sshll.u32 (!%p107_p3), %s523_s23, 6 }
  0x31   : > { %s113_s26 = scalar_lea.sflag (!%p107_p3), [#allocation3], %s523_s23  ;;  %s116_s30 = scalar_lea.vmem (!%p107_p3), [#allocation2], %s246_s24 }
  0x37   : > { %380 = dma.done.wait (%p462_p6), %s113_s26, 1024  }
  0x38   : > { %382 = vsyncadd (%p462_p6), %s113_s26, 4294966272  ;;  %s134_s25 = scalar_lea.vmem [#allocation5], %s246_s24  ;;  %s254_s28 = sshll.u32 %s440_s10, 10  ;;  %vm143_vm0 = vcmask 130048   ;;  %v135_v0 = vld [vmem:[%s116_s30] sm:$0xff]  ;;  %v136_v1 = vld [vmem:[%s116_s30 + $0x8] sm:$0xff] }
  0x39   : > { %s166_s27 = sshll.u32 %s134_s25, 4  ;;  %v137_v2 = vld [vmem:[%s116_s30 + $0x10] sm:$0xff]  ;;  %s537_s3 = scalar_lea.hbm %s590_s1, %s254_s28  ;;  %144 = vst.msk [vmem:[%s134_s25] sm:$0xff] %vm143_vm0, %v135_v0  ;;  %145 = vst.msk [vmem:[%s134_s25 + $0x8] sm:$0xff] %vm143_vm0, %v136_v1  ;;  %v138_v3 = vld [vmem:[%s116_s30 + $0x18] sm:$0xff]  ;;  %s532_s27 = int_to_ptr.vmem [resolvable:$true] %s166_s27 }
  0x3a   : > { %146 = vst.msk [vmem:[%s134_s25 + $0x10] sm:$0xff] %vm143_vm0, %v137_v2  ;;  %v139_v4 = vld [vmem:[%s116_s30 + $0x20] sm:$0xff]  ;;  %v140_v5 = vld [vmem:[%s116_s30 + $0x28] sm:$0xff]  ;;  %147 = vst.msk [vmem:[%s134_s25 + $0x18] sm:$0xff] %vm143_vm0, %v138_v3  ;;  %s153_s10 = scalar_lea.sflag [#allocation4], %s523_s23  ;;  %s335_s17 = scalar_lea.vmem %s532_s27, 1024 }
  0x3b   : > { %148 = vst.msk [vmem:[%s134_s25 + $0x20] sm:$0xff] %vm143_vm0, %v139_v4  ;;  %149 = vst.msk [vmem:[%s134_s25 + $0x28] sm:$0xff] %vm143_vm0, %v140_v5  ;;  %v141_v6 = vld [vmem:[%s116_s30 + $0x30] sm:$0xff]  ;;  %v142_v7 = vld [vmem:[%s116_s30 + $0x38] sm:$0xff]  ;;  %p336_p6 = scmp.ne.s32.totalorder %s532_s27, %s335_s17  ;;  %p597_p11 = scmp.ne.s32.totalorder %s594_s18, 0 }
  0x3c   : > { %150 = vst.msk [vmem:[%s134_s25 + $0x30] sm:$0xff] %vm143_vm0, %v141_v6  ;;  %151 = vst.msk [vmem:[%s134_s25 + $0x38] sm:$0xff] %vm143_vm0, %v142_v7  ;;  %s406_s4 = smov [#allocation5]  }
  0x3d   : > { %p337_p12 = pnand %p336_p6, %p597_p11  ;;  %s339_s5 = sshll.u32 %s406_s4, 4  ;;  %s340_s5 = int_to_ptr.vmem [resolvable:$false] %s339_s5 }
  0x3e   : > { %s341_s11 = scalar_lea.vmem %s340_s5, 2048  ;;  %p342_p8 = scmp.lt.s32.totalorder %s532_s27, %s340_s5 }
  0x3f   : > { %p338_p13 = pneg %p337_p12  ;;  %p343_p10 = scmp.lt.s32.totalorder %s341_s11, %s335_s17 }
  0x41   : > { %p344_p0 = por %p343_p10, %p342_p8 }
  0x43   : > { %p345_p2 = pnand %p344_p0, %p338_p13 }
  0x45   : > { %348 = shalt.err (!%p345_p2)
}
  0x46   : > { %s349_s13 = scalar_lea.hbm %s537_s3, 1024  ;;  %s353_s20 = scalar_lea.hbm %s590_s1, 2048 }
  0x47   : > { %p350_p4 = scmp.ne.s32.totalorder %s537_s3, %s349_s13  ;;  %p354_p9 = scmp.lt.u32.totalorder %s537_s3, %s590_s1 }
  0x48   : > { %p355_p1 = scmp.lt.u32.totalorder %s353_s20, %s349_s13  ;;  %p357_p6 = scmp.lt.u32.totalorder %s349_s13, %s537_s3 }
  0x49   : > { %p351_p5 = pnand %p350_p4, %p597_p11 }
  0x4a   : > { %p356_p3 = por %p355_p1, %p354_p9 }
  0x4b   : > { %p352_p7 = pneg %p351_p5 }
  0x4c   : > { %p358_p12 = por %p357_p6, %p356_p3 }
  0x4e   : > { %p359_p13 = pnand %p358_p12, %p352_p7 }
  0x50   : > { %362 = shalt.err (!%p359_p13)
}
  0x51   : > { %s407_s24 = smov 128   ;;  %s408_s26 = smov 8  }
  0x52   : > { %257 = dma.vmem_to_hbm [thread:$0]  (%p597_p11), %s532_s27, 1024, %s537_s3, %s153_s10, %s407_s24, %s407_s24, %s408_s26  }
  0x53 PF: > { %s181_s30 = sand.u32 1, %s389_s6   ;;  %p598_p8 = scmp.ne.s32.totalorder %s595_s19, 0 }
  0x54   : > { %p599_p10 = scmp.ge.s32.totalorder %s401_s9, 2  ;;  %s182_s25 = scalar_lea.sflag [#allocation4], %s181_s30 }
  0x56   : > { %p264_p0 = pnand %p599_p10, %p598_p8 }
  0x58   : > { %384 = dma.done.wait (!%p264_p0), %s182_s25, 1024  }
  0x59   : > { %386 = vsyncadd (!%p264_p0), %s182_s25, 4294966272  ;;  %p14_p2 = scmp.ge.s32.totalorder %s444_s12, 4   ;;  %s600_s6 = smov %s393_s7 }
  0x5a   : > { %s601_s7 = smov %s397_s8  ;;  %s602_s8 = smov %s456_s15 }
  0x5b   : > { %s603_s9 = smov %s444_s12  ;;  %16 = sbr.rel (!%p14_p2) target bundleno = 5 (0x5), region = 69 }
  0x62   :  { %187 = vsyncpa [#allocation3], 1 }
  0x63   :  { %189 = vsyncpa [#allocation3 + $0x1], 1 }
  0x64   :  { %190 = vsyncpa [#allocation4], 1 }
  0x65   :  { %192 = vsyncpa [#allocation4 + $0x1], 1 }

</bundles_post_ra>
